<compile_context>
chip_gen: v7x
topology: tpu7x:2x2x1
jax: 0.10.0
libtpu: 0.0.40
codegen_flags: <defaults>
</compile_context>

<pallas_src>
import functools

import jax
import jax.numpy as jnp
from jax.experimental import pallas as pl
from jax.experimental.pallas import tpu as pltpu


def _round_up(n, m):
    return ((n + m - 1) // m) * m


def gate_kernel(x_ref, wt_ref, weights_ref, indices_ref, *, topk, route_scale):
    """One token tile: router matmul + softmax + iterative top-k.

    x_ref:       (TM, D) native dtype (e.g. bf16)
    wt_ref:      (D, E)  native dtype, pre-transposed gate weight (resident)
    weights_ref: (TM, K) x.dtype
    indices_ref: (TM, K) int32
    """
    x = x_ref[...]
    wt = wt_ref[...]

    # Canonical (M,K)x(K,N) MXU matmul with f32 accumulation. The weight was
    # transposed once in the wrapper, so there is no per-step in-kernel relayout.
    scores = jax.lax.dot_general(
        x, wt, dimension_numbers=(((1,), (0,)), ((), ())),
        preferred_element_type=jnp.float32)                          # (TM, E) f32

    num_experts = scores.shape[-1]
    expert_ids = jax.lax.broadcasted_iota(jnp.int32, scores.shape, 1)

    # Iterative top-k over the RAW scores (softmax is monotonic -> same indices).
    # Tie-break: lowest expert index wins among equal values (torch.topk-compatible).
    # TODO(synk): a packed value+index sort key would halve the per-k cross-lane
    # reductions but relaxes exact tie parity on near-equal f32 scores.
    masked = scores
    vals, idxs = [], []
    for _ in range(topk):
        top_val = jnp.max(masked, axis=-1, keepdims=True)            # (TM, 1)
        is_top = masked == top_val
        top_idx = jnp.min(
            jnp.where(is_top, expert_ids, jnp.int32(num_experts)),
            axis=-1, keepdims=True)                                  # (TM, 1)
        vals.append(top_val)
        idxs.append(top_idx)
        masked = jnp.where(expert_ids == top_idx, -jnp.inf, masked)

    # The first top-k value IS the row max; reuse it instead of a separate
    # (TM, E) cross-lane max reduction.
    m = vals[0]                                                      # (TM, 1)
    denom = jnp.sum(jnp.exp(scores - m), axis=-1, keepdims=True)     # (TM, 1)
    # Exact divide: denom is only (TM, 1), so it is off the hot path and keeps
    # torch-softmax numerics (no approx reciprocal).
    inv = jnp.float32(route_scale) / denom

    top_scores = jnp.concatenate(vals, axis=-1)                      # (TM, K) raw scores
    indices = jnp.concatenate(idxs, axis=-1)                         # (TM, K) int32
    weights = jnp.exp(top_scores - m) * inv                          # softmax probs * scale

    # NOTE: if scores could contain NaN, `is_top` would be all-false and the
    # index would silently become num_experts; inputs here are finite.
    weights_ref[...] = weights.astype(weights_ref.dtype)             # weights.type_as(x)
    indices_ref[...] = indices


def _physical_vmem_bytes():
    try:
        return int(pltpu.get_tpu_info().vmem_capacity_bytes)
    except Exception:
        return 64 << 20   # conservative (v7x per-TensorCore)


def _vmem_estimate(tile, d, e, topk, x_bytes, w_bytes):
    return (2 * tile * d * x_bytes                 # streamed x tile, double buffered
            + 2 * d * e * w_bytes                  # resident weight (Pallas double-buffers)
            + 2 * tile * topk * (x_bytes + 4)      # weight/index output tiles
            + 8 * tile * e * 4)                    # f32 scores / exp / top-k headroom


def gate_forward(x, weight, *, topk, route_scale=1.0, token_tile=1024):
    """x: [T, D], weight: [E, D] -> (weights [T, K] in x.dtype, indices [T, K] int32).

    TODO(synk): group-limited routing (n_expert_groups > 1), sigmoid scoring,
    the dim==7168 bias path, the LoRA branch and the fp8 quantized-linear path
    are all disabled under the default ModelArgs and are not implemented here.
    """
    T, D = x.shape
    E, D2 = weight.shape
    assert D == D2

    x_bytes = jnp.dtype(x.dtype).itemsize
    w_bytes = jnp.dtype(weight.dtype).itemsize

    # VMEM budget derived from this generation's physical VMEM:
    #   v5e/v6e (128 MiB)      -> ~100-112 MiB cap, token tiles up to 1024
    #   v7x     (64 MiB per TC) -> ~36 MiB cap, token tiles around 512
    phys = _physical_vmem_bytes()
    vmem_cap = max(20 << 20, min(phys - (28 << 20), 112 << 20))

    if T < 128:
        # Decode path: do not pad a tiny batch up to a 128-row tile.
        tile = _round_up(T, 16)
    else:
        tile = 128
        for cand in (1024, 768, 512, 384, 256, 128):
            if (cand <= token_tile and cand <= _round_up(T, 128)
                    and _vmem_estimate(cand, D, E, topk, x_bytes, w_bytes) <= vmem_cap):
                tile = cand
                break
        # Keep >= 2 grid steps when possible so ("parallel",) can split tokens
        # across v7x's two TensorCores.
        if T >= 256 and pl.cdiv(T, tile) < 2:
            tile = max(128, _round_up(pl.cdiv(T, 2), 128))

    T_pad = _round_up(T, tile)
    if T_pad != T:
        x = jnp.pad(x, ((0, T_pad - T), (0, 0)))

    # One-time transpose in the wrapper: feed the MXU its canonical (K, N) RHS
    # so the resident weight is never re-laid-out inside the kernel.
    w_t = jnp.transpose(weight)                                      # (D, E)

    vmem_limit = int(min(
        max(_vmem_estimate(tile, D, E, topk, x_bytes, w_bytes) + (4 << 20), 16 << 20),
        vmem_cap))

    kernel = functools.partial(gate_kernel, topk=topk, route_scale=route_scale)
    grid = (T_pad // tile,)
    weights, indices = pl.pallas_call(
        kernel,
        out_shape=(
            jax.ShapeDtypeStruct((T_pad, topk), x.dtype),
            jax.ShapeDtypeStruct((T_pad, topk), jnp.int32),
        ),
        grid_spec=pltpu.PrefetchScalarGridSpec(
            num_scalar_prefetch=0,
            grid=grid,
            in_specs=[
                pl.BlockSpec((tile, D), lambda i: (i, 0)),    # streamed x tile
                # Resident pre-transposed gate weight (constant index_map).
                # TODO(synk): single-buffer via pipeline_mode=pl.Buffered(1) to
                # reclaim the second E*D buffer if Pallas does not already elide it.
                pl.BlockSpec((D, E), lambda i: (0, 0)),
            ],
            out_specs=[
                # TODO(synk): a lane-dense transposed (topk, T) output layout
                # would avoid topk-wide masked stores; skipped since output
                # bytes are <0.5% of the per-step x-tile DMA for this kernel.
                pl.BlockSpec((tile, topk), lambda i: (i, 0)),
                pl.BlockSpec((tile, topk), lambda i: (i, 0)),
            ],
        ),
        compiler_params=pltpu.CompilerParams(
            dimension_semantics=("parallel",),
            vmem_limit_bytes=vmem_limit),
    )(x, w_t)

    if T_pad != T:
        weights = weights[:T]
        indices = indices[:T]
    return weights, indices


def gate_reference(x, weight, *, topk, route_scale=1.0):
    # Direct port of the PyTorch forward (softmax path, n_groups == 1, no bias),
    # using the same native-dtype matmul with f32 accumulation as the kernel.
    scores = jax.lax.dot_general(
        x, weight, dimension_numbers=(((1,), (1,)), ((), ())),
        preferred_element_type=jnp.float32)
    probs = jax.nn.softmax(scores, axis=-1)
    vals, idxs = jax.lax.top_k(probs, topk)
    return (vals * route_scale).astype(x.dtype), idxs.astype(jnp.int32)


if __name__ == "__main__":
    # Scaled-down config consistent with ModelArgs:
    #   dim=256 (vs 2048), n_routed_experts=64, n_activated_experts=6,
    #   n_expert_groups=1, n_limited_groups=1, score_func='softmax',
    #   route_scale=1.0, bias=None (dim != 7168), lora=False, bf16 activations.
    batch, seq, dim = 2, 8, 256
    n_experts, topk = 64, 6
    route_scale = 1.0

    key = jax.random.PRNGKey(0)
    kx, kw = jax.random.split(key)
    x = jax.random.normal(kx, (batch * seq, dim), dtype=jnp.float32).astype(jnp.bfloat16)
    gate_weight = (jax.random.normal(kw, (n_experts, dim), dtype=jnp.float32)
                   * (1.0 / dim ** 0.5)).astype(jnp.bfloat16)

    weights, indices = gate_forward(x, gate_weight, topk=topk,
                                    route_scale=route_scale)
    jax.block_until_ready((weights, indices))

    ref_w, ref_i = gate_reference(x, gate_weight, topk=topk,
                                  route_scale=route_scale)
    assert weights.shape == (batch * seq, topk) and weights.dtype == x.dtype
    assert indices.shape == (batch * seq, topk) and indices.dtype == jnp.int32
    # bf16 operands/outputs; softmax math is exact f32 in both paths.
    assert jnp.allclose(weights.astype(jnp.float32), ref_w.astype(jnp.float32),
                        atol=1e-2, rtol=1e-2)
    assert jnp.array_equal(indices, ref_i)

    print("KERNEL_OK")
</pallas_src>

<mosaic_0001>
module attributes {stable_mosaic.version = 11 : i64} {
  func.func @gate_kernel(%arg0: i32, %arg1: memref<16x256xbf16, #tpu.memory_space<vmem>>, %arg2: memref<256x64xbf16, #tpu.memory_space<vmem>>, %arg3: memref<16x6xbf16, #tpu.memory_space<vmem>>, %arg4: memref<16x6xi32, #tpu.memory_space<vmem>>) attributes {dimension_semantics = [#tpu.dimension_semantics<parallel>], iteration_bounds = array<i64: 1>, scalar_prefetch = 0 : i64, scratch_operands = 0 : i64, tpu.core_type = #tpu.core_type<tc>, window_params = [{transform_indices = @transform_0, window_bounds = array<i64: 16, 256>}, {pipeline_mode = #tpu.pipeline_mode<synchronous>, transform_indices = @transform_1, window_bounds = array<i64: 256, 64>}, {transform_indices = @transform_2, window_bounds = array<i64: 16, 6>}, {transform_indices = @transform_3, window_bounds = array<i64: 16, 6>}]} {
    %c0 = arith.constant 0 : index
    %c0_0 = arith.constant 0 : index
    %0 = vector.load %arg1[%c0, %c0_0] : memref<16x256xbf16, #tpu.memory_space<vmem>>, vector<16x256xbf16>
    %c0_1 = arith.constant 0 : index
    %c0_2 = arith.constant 0 : index
    %1 = vector.load %arg2[%c0_1, %c0_2] : memref<256x64xbf16, #tpu.memory_space<vmem>>, vector<256x64xbf16>
    %cst = arith.constant dense<0.000000e+00> : vector<16x64xf32>
    %2 = tpu.matmul %0, %1, %cst {dimension_numbers = #tpu.dot_dimension_numbers<[1], [0], [0], [1], [0, 0, 1, 1], [], []>} : vector<16x256xbf16>, vector<256x64xbf16>, vector<16x64xf32> -> vector<16x64xf32>
    %3 = tpu.iota {dimensions = array<i32: 1>} : vector<16x64xi32>
    %cst_3 = arith.constant dense<0xFF800000> : vector<16xf32>
    %4 = vector.multi_reduction <maximumf>, %2, %cst_3 [1] : vector<16x64xf32> to vector<16xf32>
    %5 = vector.shape_cast %4 : vector<16xf32> to vector<16x1xf32>
    %6 = vector.broadcast %5 : vector<16x1xf32> to vector<16x64xf32>
    %7 = arith.cmpf oeq, %2, %6 : vector<16x64xf32>
    %c64_i32 = arith.constant 64 : i32
    %8 = vector.broadcast %c64_i32 : i32 to vector<16x64xi32>
    %9 = arith.select %7, %3, %8 : vector<16x64xi1>, vector<16x64xi32>
    %cst_4 = arith.constant dense<2147483647> : vector<16xi32>
    %10 = vector.multi_reduction <minsi>, %9, %cst_4 [1] : vector<16x64xi32> to vector<16xi32>
    %11 = vector.shape_cast %10 : vector<16xi32> to vector<16x1xi32>
    %12 = vector.broadcast %11 : vector<16x1xi32> to vector<16x64xi32>
    %13 = arith.cmpi eq, %3, %12 : vector<16x64xi32>
    %cst_5 = arith.constant 0xFF800000 : f32
    %14 = vector.broadcast %cst_5 : f32 to vector<16x64xf32>
    %15 = arith.select %13, %14, %2 : vector<16x64xi1>, vector<16x64xf32>
    %cst_6 = arith.constant dense<0xFF800000> : vector<16xf32>
    %16 = vector.multi_reduction <maximumf>, %15, %cst_6 [1] : vector<16x64xf32> to vector<16xf32>
    %17 = vector.shape_cast %16 : vector<16xf32> to vector<16x1xf32>
    %18 = vector.broadcast %17 : vector<16x1xf32> to vector<16x64xf32>
    %19 = arith.cmpf oeq, %15, %18 : vector<16x64xf32>
    %c64_i32_7 = arith.constant 64 : i32
    %20 = vector.broadcast %c64_i32_7 : i32 to vector<16x64xi32>
    %21 = arith.select %19, %3, %20 : vector<16x64xi1>, vector<16x64xi32>
    %cst_8 = arith.constant dense<2147483647> : vector<16xi32>
    %22 = vector.multi_reduction <minsi>, %21, %cst_8 [1] : vector<16x64xi32> to vector<16xi32>
    %23 = vector.shape_cast %22 : vector<16xi32> to vector<16x1xi32>
    %24 = vector.broadcast %23 : vector<16x1xi32> to vector<16x64xi32>
    %25 = arith.cmpi eq, %3, %24 : vector<16x64xi32>
    %cst_9 = arith.constant 0xFF800000 : f32
    %26 = vector.broadcast %cst_9 : f32 to vector<16x64xf32>
    %27 = arith.select %25, %26, %15 : vector<16x64xi1>, vector<16x64xf32>
    %cst_10 = arith.constant dense<0xFF800000> : vector<16xf32>
    %28 = vector.multi_reduction <maximumf>, %27, %cst_10 [1] : vector<16x64xf32> to vector<16xf32>
    %29 = vector.shape_cast %28 : vector<16xf32> to vector<16x1xf32>
    %30 = vector.broadcast %29 : vector<16x1xf32> to vector<16x64xf32>
    %31 = arith.cmpf oeq, %27, %30 : vector<16x64xf32>
    %c64_i32_11 = arith.constant 64 : i32
    %32 = vector.broadcast %c64_i32_11 : i32 to vector<16x64xi32>
    %33 = arith.select %31, %3, %32 : vector<16x64xi1>, vector<16x64xi32>
    %cst_12 = arith.constant dense<2147483647> : vector<16xi32>
    %34 = vector.multi_reduction <minsi>, %33, %cst_12 [1] : vector<16x64xi32> to vector<16xi32>
    %35 = vector.shape_cast %34 : vector<16xi32> to vector<16x1xi32>
    %36 = vector.broadcast %35 : vector<16x1xi32> to vector<16x64xi32>
    %37 = arith.cmpi eq, %3, %36 : vector<16x64xi32>
    %cst_13 = arith.constant 0xFF800000 : f32
    %38 = vector.broadcast %cst_13 : f32 to vector<16x64xf32>
    %39 = arith.select %37, %38, %27 : vector<16x64xi1>, vector<16x64xf32>
    %cst_14 = arith.constant dense<0xFF800000> : vector<16xf32>
    %40 = vector.multi_reduction <maximumf>, %39, %cst_14 [1] : vector<16x64xf32> to vector<16xf32>
    %41 = vector.shape_cast %40 : vector<16xf32> to vector<16x1xf32>
    %42 = vector.broadcast %41 : vector<16x1xf32> to vector<16x64xf32>
    %43 = arith.cmpf oeq, %39, %42 : vector<16x64xf32>
    %c64_i32_15 = arith.constant 64 : i32
    %44 = vector.broadcast %c64_i32_15 : i32 to vector<16x64xi32>
    %45 = arith.select %43, %3, %44 : vector<16x64xi1>, vector<16x64xi32>
    %cst_16 = arith.constant dense<2147483647> : vector<16xi32>
    %46 = vector.multi_reduction <minsi>, %45, %cst_16 [1] : vector<16x64xi32> to vector<16xi32>
    %47 = vector.shape_cast %46 : vector<16xi32> to vector<16x1xi32>
    %48 = vector.broadcast %47 : vector<16x1xi32> to vector<16x64xi32>
    %49 = arith.cmpi eq, %3, %48 : vector<16x64xi32>
    %cst_17 = arith.constant 0xFF800000 : f32
    %50 = vector.broadcast %cst_17 : f32 to vector<16x64xf32>
    %51 = arith.select %49, %50, %39 : vector<16x64xi1>, vector<16x64xf32>
    %cst_18 = arith.constant dense<0xFF800000> : vector<16xf32>
    %52 = vector.multi_reduction <maximumf>, %51, %cst_18 [1] : vector<16x64xf32> to vector<16xf32>
    %53 = vector.shape_cast %52 : vector<16xf32> to vector<16x1xf32>
    %54 = vector.broadcast %53 : vector<16x1xf32> to vector<16x64xf32>
    %55 = arith.cmpf oeq, %51, %54 : vector<16x64xf32>
    %c64_i32_19 = arith.constant 64 : i32
    %56 = vector.broadcast %c64_i32_19 : i32 to vector<16x64xi32>
    %57 = arith.select %55, %3, %56 : vector<16x64xi1>, vector<16x64xi32>
    %cst_20 = arith.constant dense<2147483647> : vector<16xi32>
    %58 = vector.multi_reduction <minsi>, %57, %cst_20 [1] : vector<16x64xi32> to vector<16xi32>
    %59 = vector.shape_cast %58 : vector<16xi32> to vector<16x1xi32>
    %60 = vector.broadcast %59 : vector<16x1xi32> to vector<16x64xi32>
    %61 = arith.cmpi eq, %3, %60 : vector<16x64xi32>
    %cst_21 = arith.constant 0xFF800000 : f32
    %62 = vector.broadcast %cst_21 : f32 to vector<16x64xf32>
    %63 = arith.select %61, %62, %51 : vector<16x64xi1>, vector<16x64xf32>
    %cst_22 = arith.constant dense<0xFF800000> : vector<16xf32>
    %64 = vector.multi_reduction <maximumf>, %63, %cst_22 [1] : vector<16x64xf32> to vector<16xf32>
    %65 = vector.shape_cast %64 : vector<16xf32> to vector<16x1xf32>
    %66 = vector.broadcast %65 : vector<16x1xf32> to vector<16x64xf32>
    %67 = arith.cmpf oeq, %63, %66 : vector<16x64xf32>
    %c64_i32_23 = arith.constant 64 : i32
    %68 = vector.broadcast %c64_i32_23 : i32 to vector<16x64xi32>
    %69 = arith.select %67, %3, %68 : vector<16x64xi1>, vector<16x64xi32>
    %cst_24 = arith.constant dense<2147483647> : vector<16xi32>
    %70 = vector.multi_reduction <minsi>, %69, %cst_24 [1] : vector<16x64xi32> to vector<16xi32>
    %71 = vector.shape_cast %70 : vector<16xi32> to vector<16x1xi32>
    %72 = vector.broadcast %5 : vector<16x1xf32> to vector<16x64xf32>
    %73 = arith.subf %2, %72 : vector<16x64xf32>
    %74 = math.exp %73 : vector<16x64xf32>
    %cst_25 = arith.constant dense<0.000000e+00> : vector<16xf32>
    %75 = vector.multi_reduction <add>, %74, %cst_25 [1] : vector<16x64xf32> to vector<16xf32>
    %76 = vector.shape_cast %75 : vector<16xf32> to vector<16x1xf32>
    %cst_26 = arith.constant 1.000000e+00 : f32
    %77 = vector.broadcast %cst_26 : f32 to vector<16x1xf32>
    %78 = arith.divf %77, %76 : vector<16x1xf32>
    %79 = tpu.concatenate %5, %17, %29, %41, %53, %65 in 1 : vector<16x1xf32>, vector<16x1xf32>, vector<16x1xf32>, vector<16x1xf32>, vector<16x1xf32>, vector<16x1xf32> -> vector<16x6xf32>
    %80 = tpu.concatenate %11, %23, %35, %47, %59, %71 in 1 : vector<16x1xi32>, vector<16x1xi32>, vector<16x1xi32>, vector<16x1xi32>, vector<16x1xi32>, vector<16x1xi32> -> vector<16x6xi32>
    %81 = vector.broadcast %5 : vector<16x1xf32> to vector<16x6xf32>
    %82 = arith.subf %79, %81 : vector<16x6xf32>
    %83 = math.exp %82 : vector<16x6xf32>
    %84 = vector.broadcast %78 : vector<16x1xf32> to vector<16x6xf32>
    %85 = arith.mulf %83, %84 : vector<16x6xf32>
    %86 = arith.truncf %85 : vector<16x6xf32> to vector<16x6xbf16>
    %c0_27 = arith.constant 0 : index
    %c0_28 = arith.constant 0 : index
    %87 = vector.load %arg3[%c0_27, %c0_28] : memref<16x6xbf16, #tpu.memory_space<vmem>>, vector<16x6xbf16>
    tpu.vector_store %arg3[%c0_27, %c0_28], %86 {strides = array<i32>} : memref<16x6xbf16, #tpu.memory_space<vmem>>, vector<16x6xbf16>,
    %c0_29 = arith.constant 0 : index
    %c0_30 = arith.constant 0 : index
    %88 = vector.load %arg4[%c0_29, %c0_30] : memref<16x6xi32, #tpu.memory_space<vmem>>, vector<16x6xi32>
    tpu.vector_store %arg4[%c0_29, %c0_30], %80 {strides = array<i32>} : memref<16x6xi32, #tpu.memory_space<vmem>>, vector<16x6xi32>,
    return
  }
  func.func @transform_0(%arg0: i32) -> (i32, i32) {
    %c0_i32 = arith.constant 0 : i32
    %c0_i32_0 = arith.constant 0 : i32
    return %arg0, %c0_i32 : i32, i32
  }
  func.func @transform_1(%arg0: i32) -> (i32, i32) {
    %c0_i32 = arith.constant 0 : i32
    %c0_i32_0 = arith.constant 0 : i32
    %c0_i32_1 = arith.constant 0 : i32
    return %c0_i32, %c0_i32_0 : i32, i32
  }
  func.func @transform_2(%arg0: i32) -> (i32, i32) {
    %c0_i32 = arith.constant 0 : i32
    %c0_i32_0 = arith.constant 0 : i32
    return %arg0, %c0_i32 : i32, i32
  }
  func.func @transform_3(%arg0: i32) -> (i32, i32) {
    %c0_i32 = arith.constant 0 : i32
    %c0_i32_0 = arith.constant 0 : i32
    return %arg0, %c0_i32 : i32, i32
  }
}

</mosaic_0001>

<bundles_post_ra>
// kernel: tpu_custom_call.1
= control target key start
LH: loop header
LB: loop body
LE: loop exit
PB: predicated region body
PF: predicated region fallthrough
CT: control target
= control target key end

     0   :  { %vm197_vm0 = vcmask 523264   ;;  %v195_v26 = vlaneseq  ;;  %s830_s1 = inlined_call_operand.vmem [shape: bf16[256,64], index: 1, kind: input, shape index: {}]   ;;  %s831_s0 = inlined_call_operand.vmem [shape: bf16[16,256], index: 0, kind: input, shape index: {}]   ;;  %s832_s2 = inlined_call_operand.vmem [shape: bf16[16,6], index: 2, kind: output, shape index: {0}]   ;;  %s833_s3 = inlined_call_operand.vmem [shape: s32[16,6], index: 3, kind: output, shape index: {1}]  }
   0x1   :  { %v573_v0 = vld [vmem:[%s830_s1 + $0x40] sm:$0xff]   ;;  %v575_v2 = vld [vmem:[%s830_s1 + $0x48] sm:$0xff]   ;;  %v577_v4 = vld [vmem:[%s830_s1 + $0x50] sm:$0xff]  }
   0x2   :  { %v574_v1 = vld [vmem:[%s830_s1] sm:$0xff]   ;;  %551 = vmatprep.subr.bf16.mxu0 %v573_v0  ;;  %v576_v3 = vld [vmem:[%s830_s1 + $0x8] sm:$0xff]   ;;  %v578_v5 = vld [vmem:[%s830_s1 + $0x10] sm:$0xff]   ;;  %v686_v27 = vand.u32 127, %v195_v26 }
   0x3   :  { %552 = vmatpush3.bf16.msra.mxu0 %v574_v1  ;;  %v579_v6 = vld [vmem:[%s830_s1 + $0x58] sm:$0xff]   ;;  %v581_v8 = vld [vmem:[%s830_s1 + $0x60] sm:$0xff]   ;;  %v583_v10 = vld [vmem:[%s830_s1 + $0x68] sm:$0xff]  }
   0x4   :  { %553 = vmatprep.subr.bf16.mxu0 %v575_v2  ;;  %v580_v7 = vld [vmem:[%s830_s1 + $0x18] sm:$0xff]   ;;  %v582_v9 = vld [vmem:[%s830_s1 + $0x20] sm:$0xff]   ;;  %v584_v12 = vld [vmem:[%s830_s1 + $0x28] sm:$0xff]  }
   0x5   :  { %v591_v11 = vld [vmem:[%s831_s0 + $0x4] ss:$8 sps:$4 sm:$0xff]   ;;  %v585_v13 = vld [vmem:[%s830_s1 + $0x70] sm:$0xff]   ;;  %v587_v15 = vld [vmem:[%s830_s1 + $0x78] sm:$0xff]  }
   0x6   :  { %186 = vmatprep.mubr.bf16.mxu0 %v591_v11  ;;  %v586_v14 = vld [vmem:[%s830_s1 + $0x30] sm:$0xff]   ;;  %v588_v16 = vld [vmem:[%s830_s1 + $0x38] sm:$0xff]   ;;  %v589_v17 = vld [vmem:[%s831_s0] ss:$8 sps:$4 sm:$0xff]  }
   0x7   :  { %554 = vmatpush3.bf16.msra.mxu0 %v576_v3 }
   0x8   :  { %555 = vmatprep.subr.bf16.mxu0 %v577_v4 }
   0xb   :  { %556 = vmatpush3.bf16.msra.mxu0 %v578_v5 }
   0xc   :  { %557 = vmatprep.subr.bf16.mxu0 %v579_v6 }
   0xf   :  { %558 = vmatpush3.bf16.msra.mxu0 %v580_v7 }
  0x10   :  { %559 = vmatprep.subr.bf16.mxu0 %v581_v8 }
  0x13   :  { %560 = vmatpush3.bf16.msra.mxu0 %v582_v9 }
  0x14   :  { %561 = vmatprep.subr.bf16.mxu0 %v583_v10 }
  0x17   :  { %562 = vmatpush3.bf16.msra.mxu0 %v584_v12 }
  0x18   :  { %563 = vmatprep.subr.bf16.mxu0 %v585_v13 }
  0x1b   :  { %564 = vmatpush3.bf16.msra.mxu0 %v586_v14 }
  0x1c   :  { %565 = vmatprep.subr.bf16.mxu0 %v587_v15 }
  0x1f   :  { %566 = vmatpush3.bf16.msra.mxu0 %v588_v16 }
  0x22   :  { %187 = vmatmul.mubr.bf16.vlgmr.msra.gmra.mrb[0].mxu0 %v589_v17 }
  0xf5   :  { %v567_v18 = vpop.f32.mrb[0].mxu0 }
  0xf6   :  { %v568_v19 = vpop.f32.mrb[1].mxu0 }
  0xf7   :  { %v678_v20 = vadd.f32 %v568_v19, %v567_v18  ;;  %v570_v21 = vpop.f32.mrb[2].mxu0 }
  0xf8   :  { %v571_v22 = vpop.f32.mrb[3].mxu0 }
  0xf9   :  { %v680_v23 = vadd.f32 %v571_v22, %v570_v21  ;;  %v198_v24 = vsel %vm197_vm0, %v678_v20, -inf }
  0xfa   :  { %199 = vmax.xlane.f32.xlu0 %v198_v24 }
  0xfb   :  { %v201_v25 = vsel %vm197_vm0, %v680_v23, -inf }
  0xfe   :  { %202 = vmax.xlane.f32.xlu0 %v201_v25 }
 0x187   :  { %v688_v28 = vpop.xlane.xlu0 %199 }
 0x188   :  { %vm204_vm1 = vcmp.eq.f32.partialorder %v678_v20, %v688_v28 }
 0x189   :  { %v206_v29 = vsel %vm204_vm1, %v686_v27, 64 }
 0x18a   :  { %v208_v30 = vsel %vm197_vm0, %v206_v29, 2147483647 }
 0x18b   :  { %v694_v31 = vpop.xlane.xlu0 %202  ;;  %v210_v32 = vshra.s32 %v208_v30, 16  ;;  %v209_v38 = vand.u32 65535, %v208_v30 }
 0x18c   :  { %vm205_vm2 = vcmp.eq.f32.partialorder %v680_v23, %v694_v31 }
 0x18d   :  { %v212_v33 = vcvt.s32.f32 %v210_v32  ;;  %v207_v34 = vsel %vm205_vm2, %v686_v27, 64  ;;  %v211_v40 = vcvt.s32.f32 %v209_v38  ;;  %vm474_vm2 = vcmask 7168  }
 0x18e   :  { %v223_v35 = vsel %vm197_vm0, %v207_v34, 2147483647 }
 0x18f   :  { %213 = vmin.xlane.f32.xlu1 %v212_v33  ;;  %v225_v36 = vshra.s32 %v223_v35, 16  ;;  %v224_v41 = vand.u32 65535, %v223_v35 }
 0x191   :  { %v227_v37 = vcvt.s32.f32 %v225_v36  ;;  %v226_v44 = vcvt.s32.f32 %v224_v41 }
 0x193   :  { %228 = vmin.xlane.f32.xlu1 %v227_v37 }
 0x21c   :  { %v214_v39 = vpop.xlane.xlu1 %213 }
 0x21d   :  { %vm215_vm3 = vcmp.eq.f32.partialorder %v212_v33, %v214_v39  ;;  %v220_v46 = vcvt.f32.s32 %v214_v39 }
 0x21e   :  { %v216_v42 = vsel %vm215_vm3, %v211_v40, inf  ;;  %vm477_vm3 = vcmask 15360  }
 0x21f   :  { %217 = vmin.xlane.f32.xlu0 %v216_v42  ;;  %v221_v48 = vshll.u32 %v220_v46, 16 }
 0x220   :  { %v229_v43 = vpop.xlane.xlu1 %228 }
 0x221   :  { %vm230_vm4 = vcmp.eq.f32.partialorder %v227_v37, %v229_v43  ;;  %v235_v49 = vcvt.f32.s32 %v229_v43 }
 0x222   :  { %v231_v45 = vsel %vm230_vm4, %v226_v44, inf }
 0x223   :  { %232 = vmin.xlane.f32.xlu1 %v231_v45  ;;  %v236_v53 = vshll.u32 %v235_v49, 16 }
 0x2ac   :  { %v218_v47 = vpop.xlane.xlu0 %217 }
 0x2ad   :  { %v219_v50 = vcvt.f32.s32 %v218_v47 }
 0x2af   :  { %v700_v51 = vadd.s32 %v221_v48, %v219_v50 }
 0x2b0   :  { %v233_v52 = vpop.xlane.xlu1 %232 }
 0x2b1   :  { %v234_v54 = vcvt.f32.s32 %v233_v52  ;;  %vm238_vm5 = vcmp.eq.s32.totalorder %v686_v27, %v700_v51 }
 0x2b2   :  { %v240_v55 = vsel %vm238_vm5, -inf, %v678_v20 }
 0x2b3   :  { %v705_v56 = vadd.s32 %v236_v53, %v234_v54  ;;  %v242_v57 = vsel %vm197_vm0, %v240_v55, -inf }
 0x2b4   :  { %243 = vmax.xlane.f32.xlu0 %v242_v57 }
 0x2b5   :  { %vm239_vm6 = vcmp.eq.s32.totalorder %v686_v27, %v705_v56 }
 0x2b6   :  { %v241_v58 = vsel %vm239_vm6, -inf, %v680_v23 }
 0x2b7   :  { %v245_v59 = vsel %vm197_vm0, %v241_v58, -inf }
 0x2b8   :  { %246 = vmax.xlane.f32.xlu1 %v245_v59 }
 0x341   :  { %v712_v60 = vpop.xlane.xlu0 %243 }
 0x342   :  { %vm248_vm7 = vcmp.eq.f32.partialorder %v240_v55, %v712_v60 }
 0x343   :  { %v250_v61 = vsel %vm248_vm7, %v686_v27, 64 }
 0x344   :  { %v252_v62 = vsel %vm197_vm0, %v250_v61, 2147483647 }
 0x345   :  { %v717_v63 = vpop.xlane.xlu1 %246  ;;  %v254_v0 = vshra.s32 %v252_v62, 16  ;;  %v253_v6 = vand.u32 65535, %v252_v62 }
 0x346   :  { %vm249_vm8 = vcmp.eq.f32.partialorder %v241_v58, %v717_v63 }
 0x347   :  { %v251_v1 = vsel %vm249_vm8, %v686_v27, 64  ;;  %v256_v2 = vcvt.s32.f32 %v254_v0  ;;  %v255_v8 = vcvt.s32.f32 %v253_v6 }
 0x348   :  { %v267_v3 = vsel %vm197_vm0, %v251_v1, 2147483647 }
 0x349   :  { %257 = vmin.xlane.f32.xlu0 %v256_v2  ;;  %v269_v4 = vshra.s32 %v267_v3, 16  ;;  %v268_v9 = vand.u32 65535, %v267_v3 }
 0x34b   :  { %v271_v5 = vcvt.s32.f32 %v269_v4  ;;  %v270_v12 = vcvt.s32.f32 %v268_v9 }
 0x34d   :  { %272 = vmin.xlane.f32.xlu1 %v271_v5 }
 0x3d6   :  { %v258_v7 = vpop.xlane.xlu0 %257 }
 0x3d7   :  { %vm259_vm9 = vcmp.eq.f32.partialorder %v256_v2, %v258_v7  ;;  %v264_v14 = vcvt.f32.s32 %v258_v7 }
 0x3d8   :  { %v260_v10 = vsel %vm259_vm9, %v255_v8, inf }
 0x3d9   :  { %261 = vmin.xlane.f32.xlu0 %v260_v10  ;;  %v265_v16 = vshll.u32 %v264_v14, 16 }
 0x3da   :  { %v273_v11 = vpop.xlane.xlu1 %272 }
 0x3db   :  { %vm274_vm10 = vcmp.eq.f32.partialorder %v271_v5, %v273_v11  ;;  %v279_v17 = vcvt.f32.s32 %v273_v11 }
 0x3dc   :  { %v275_v13 = vsel %vm274_vm10, %v270_v12, inf  ;;  %vm480_vm10 = vcmask 23552  }
 0x3dd   :  { %276 = vmin.xlane.f32.xlu1 %v275_v13  ;;  %v280_v22 = vshll.u32 %v279_v17, 16 }
 0x466   :  { %v262_v15 = vpop.xlane.xlu0 %261 }
 0x467   :  { %v263_v18 = vcvt.f32.s32 %v262_v15 }
 0x469   :  { %v266_v19 = vadd.s32 %v265_v16, %v263_v18 }
 0x46a   :  { %v277_v21 = vpop.xlane.xlu1 %276 }
 0x46b   :  { %v278_v24 = vcvt.f32.s32 %v277_v21  ;;  %vm282_vm11 = vcmp.eq.s32.totalorder %v686_v27, %v266_v19  ;;  %v489_v59 = vsel %vm474_vm2, %v700_v51, %v266_v19 }
 0x46c   :  { %v284_v25 = vsel %vm282_vm11, -inf, %v240_v55 }
 0x46d   :  { %v281_v26 = vadd.s32 %v280_v22, %v278_v24  ;;  %v286_v29 = vsel %vm197_vm0, %v284_v25, -inf }
 0x46e   :  { %287 = vmax.xlane.f32.xlu0 %v286_v29 }
 0x46f   :  { %vm283_vm12 = vcmp.eq.s32.totalorder %v686_v27, %v281_v26  ;;  %v490_v5 = vsel %vm474_vm2, %v705_v56, %v281_v26 }
 0x470   :  { %v285_v30 = vsel %vm283_vm12, -inf, %v241_v58 }
 0x471   :  { %v289_v32 = vsel %vm197_vm0, %v285_v30, -inf }
 0x472   :  { %290 = vmax.xlane.f32.xlu1 %v289_v32 }
 0x4fb   :  { %v726_v33 = vpop.xlane.xlu0 %287 }
 0x4fc   :  { %vm292_vm13 = vcmp.eq.f32.partialorder %v284_v25, %v726_v33 }
 0x4fd   :  { %v294_v34 = vsel %vm292_vm13, %v686_v27, 64 }
 0x4fe   :  { %v296_v35 = vsel %vm197_vm0, %v294_v34, 2147483647 }
 0x4ff   :  { %v731_v36 = vpop.xlane.xlu1 %290  ;;  %v298_v37 = vshra.s32 %v296_v35, 16  ;;  %v297_v43 = vand.u32 65535, %v296_v35 }
 0x500   :  { %vm293_vm14 = vcmp.eq.f32.partialorder %v285_v30, %v731_v36 }
 0x501   :  { %v295_v38 = vsel %vm293_vm14, %v686_v27, 64  ;;  %v300_v39 = vcvt.s32.f32 %v298_v37  ;;  %v299_v45 = vcvt.s32.f32 %v297_v43 }
 0x502   :  { %v311_v40 = vsel %vm197_vm0, %v295_v38, 2147483647 }
 0x503   :  { %301 = vmin.xlane.f32.xlu0 %v300_v39  ;;  %v313_v41 = vshra.s32 %v311_v40, 16  ;;  %v312_v46 = vand.u32 65535, %v311_v40 }
 0x505   :  { %v315_v42 = vcvt.s32.f32 %v313_v41  ;;  %v314_v49 = vcvt.s32.f32 %v312_v46 }
 0x507   :  { %316 = vmin.xlane.f32.xlu1 %v315_v42 }
 0x590   :  { %v302_v44 = vpop.xlane.xlu0 %301 }
 0x591   :  { %vm303_vm15 = vcmp.eq.f32.partialorder %v300_v39, %v302_v44  ;;  %v308_v52 = vcvt.f32.s32 %v302_v44 }
 0x592   :  { %v304_v47 = vsel %vm303_vm15, %v299_v45, inf }
 0x593   :  { %305 = vmin.xlane.f32.xlu0 %v304_v47  ;;  %v309_v54 = vshll.u32 %v308_v52, 16 }
 0x594   :  { %v317_v48 = vpop.xlane.xlu1 %316 }
 0x595   :  { %vm318_vm1 = vcmp.eq.f32.partialorder %v315_v42, %v317_v48  ;;  %v323_v55 = vcvt.f32.s32 %v317_v48 }
 0x596   :  { %v319_v50 = vsel %vm318_vm1, %v314_v49, inf }
 0x597   :  { %320 = vmin.xlane.f32.xlu1 %v319_v50  ;;  %v324_v62 = vshll.u32 %v323_v55, 16 }
 0x620   :  { %v306_v53 = vpop.xlane.xlu0 %305 }
 0x621   :  { %v307_v57 = vcvt.f32.s32 %v306_v53 }
 0x623   :  { %v310_v58 = vadd.s32 %v309_v54, %v307_v57 }
 0x624   :  { %v321_v61 = vpop.xlane.xlu1 %320 }
 0x625   :  { %v491_v0 = vsel %vm477_vm3, %v489_v59, %v310_v58  ;;  %v322_v1 = vcvt.f32.s32 %v321_v61  ;;  %vm326_vm4 = vcmp.eq.s32.totalorder %v686_v27, %v310_v58 }
 0x626   :  { %v328_v2 = vsel %vm326_vm4, -inf, %v284_v25  ;;  %vm483_vm4 = vcmask 31744  }
 0x627   :  { %v325_v3 = vadd.s32 %v324_v62, %v322_v1  ;;  %v330_v4 = vsel %vm197_vm0, %v328_v2, -inf }
 0x628   :  { %331 = vmax.xlane.f32.xlu0 %v330_v4 }
 0x629   :  { %v492_v6 = vsel %vm477_vm3, %v490_v5, %v325_v3  ;;  %vm327_vm5 = vcmp.eq.s32.totalorder %v686_v27, %v325_v3 }
 0x62a   :  { %v329_v51 = vsel %vm327_vm5, -inf, %v285_v30 }
 0x62b   :  { %v333_v7 = vsel %vm197_vm0, %v329_v51, -inf }
 0x62c   :  { %334 = vmax.xlane.f32.xlu1 %v333_v7 }
 0x6b5   :  { %v746_v8 = vpop.xlane.xlu0 %331 }
 0x6b6   :  { %vm336_vm6 = vcmp.eq.f32.partialorder %v328_v2, %v746_v8 }
 0x6b7   :  { %v338_v9 = vsel %vm336_vm6, %v686_v27, 64 }
 0x6b8   :  { %v340_v10 = vsel %vm197_vm0, %v338_v9, 2147483647 }
 0x6b9   :  { %v751_v11 = vpop.xlane.xlu1 %334  ;;  %v342_v56 = vshra.s32 %v340_v10, 16  ;;  %v341_v17 = vand.u32 65535, %v340_v10 }
 0x6ba   :  { %vm337_vm7 = vcmp.eq.f32.partialorder %v329_v51, %v751_v11 }
 0x6bb   :  { %v339_v12 = vsel %vm337_vm7, %v686_v27, 64  ;;  %v344_v13 = vcvt.s32.f32 %v342_v56  ;;  %v343_v19 = vcvt.s32.f32 %v341_v17 }
 0x6bc   :  { %v355_v14 = vsel %vm197_vm0, %v339_v12, 2147483647 }
 0x6bd   :  { %345 = vmin.xlane.f32.xlu0 %v344_v13  ;;  %v357_v15 = vshra.s32 %v355_v14, 16  ;;  %v356_v21 = vand.u32 65535, %v355_v14 }
 0x6bf   :  { %v359_v16 = vcvt.s32.f32 %v357_v15  ;;  %v358_v25 = vcvt.s32.f32 %v356_v21 }
 0x6c1   :  { %360 = vmin.xlane.f32.xlu1 %v359_v16 }
 0x74a   :  { %v346_v18 = vpop.xlane.xlu0 %345 }
 0x74b   :  { %vm347_vm8 = vcmp.eq.f32.partialorder %v344_v13, %v346_v18  ;;  %v352_v29 = vcvt.f32.s32 %v346_v18 }
 0x74c   :  { %v348_v22 = vsel %vm347_vm8, %v343_v19, inf }
 0x74d   :  { %349 = vmin.xlane.f32.xlu0 %v348_v22  ;;  %v353_v32 = vshll.u32 %v352_v29, 16 }
 0x74e   :  { %v361_v24 = vpop.xlane.xlu1 %360 }
 0x74f   :  { %vm362_vm9 = vcmp.eq.f32.partialorder %v359_v16, %v361_v24  ;;  %v367_v34 = vcvt.f32.s32 %v361_v24  ;;  %v458_v24 = vsub.f32 %v678_v20, %v688_v28 }
 0x750   :  { %v363_v26 = vsel %vm362_vm9, %v358_v25, inf  ;;  %vm486_vm9 = vcmask 39936  }
 0x751   :  { %364 = vmin.xlane.f32.xlu1 %v363_v26  ;;  %v368_v39 = vshll.u32 %v367_v34, 16  ;;  %v460_v25 = vmul.f32 1.442695, %v458_v24  ;;  %v459_v26 = vsub.f32 %v680_v23, %v694_v31 }
 0x753   :  { %592 = vpow2.f32 %v460_v25  ;;  %v462_v29 = vmul.f32 1.442695, %v459_v26 }
 0x755   :  { %594 = vpow2.f32 %v462_v29 }
 0x7da   :  { %v350_v30 = vpop.xlane.xlu0 %349 }
 0x7db   :  { %v351_v35 = vcvt.f32.s32 %v350_v30 }
 0x7dd   :  { %v354_v37 = vadd.s32 %v353_v32, %v351_v35 }
 0x7de   :  { %v365_v38 = vpop.xlane.xlu1 %364 }
 0x7df   :  { %v493_v40 = vsel %vm480_vm10, %v491_v0, %v354_v37  ;;  %v366_v41 = vcvt.f32.s32 %v365_v38  ;;  %vm370_vm11 = vcmp.eq.s32.totalorder %v686_v27, %v354_v37 }
 0x7e0   :  { %v372_v42 = vsel %vm370_vm11, -inf, %v328_v2 }
 0x7e1   :  { %v369_v43 = vadd.s32 %v368_v39, %v366_v41  ;;  %v374_v44 = vsel %vm197_vm0, %v372_v42, -inf }
 0x7e2   :  { %375 = vmax.xlane.f32.xlu0 %v374_v44 }
 0x7e3   :  { %v494_v45 = vsel %vm480_vm10, %v492_v6, %v369_v43  ;;  %vm371_vm12 = vcmp.eq.s32.totalorder %v686_v27, %v369_v43 }
 0x7e4   :  { %v373_v46 = vsel %vm371_vm12, -inf, %v329_v51 }
 0x7e5   :  { %v377_v47 = vsel %vm197_vm0, %v373_v46, -inf }
 0x7e6   :  { %378 = vmax.xlane.f32.xlu1 %v377_v47 }
 0x86f   :  { %v762_v48 = vpop.xlane.xlu0 %375 }
 0x870   :  { %vm380_vm13 = vcmp.eq.f32.partialorder %v372_v42, %v762_v48 }
 0x871   :  { %v382_v49 = vsel %vm380_vm13, %v686_v27, 64 }
 0x872   :  { %v384_v50 = vsel %vm197_vm0, %v382_v49, 2147483647  ;;  %v476_v49 = vsel %vm474_vm2, %v694_v31, %v717_v63 }
 0x873   :  { %v767_v52 = vpop.xlane.xlu1 %378  ;;  %v386_v53 = vshra.s32 %v384_v50, 16  ;;  %v385_v61 = vand.u32 65535, %v384_v50 }
 0x874   :  { %vm381_vm14 = vcmp.eq.f32.partialorder %v373_v46, %v767_v52 }
 0x875   :  { %v383_v54 = vsel %vm381_vm14, %v686_v27, 64  ;;  %v388_v55 = vcvt.s32.f32 %v386_v53  ;;  %v387_v0 = vcvt.s32.f32 %v385_v61  ;;  %v479_v53 = vsel %vm477_vm3, %v476_v49, %v731_v36 }
 0x876   :  { %v399_v57 = vsel %vm197_vm0, %v383_v54, 2147483647 }
 0x877   :  { %389 = vmin.xlane.f32.xlu0 %v388_v55  ;;  %v401_v58 = vshra.s32 %v399_v57, 16  ;;  %v400_v1 = vand.u32 65535, %v399_v57 }
 0x879   :  { %v403_v59 = vcvt.s32.f32 %v401_v58  ;;  %v402_v4 = vcvt.s32.f32 %v400_v1 }
 0x87b   :  { %404 = vmin.xlane.f32.xlu1 %v403_v59 }
 0x904   :  { %v390_v62 = vpop.xlane.xlu0 %389 }
 0x905   :  { %vm391_vm15 = vcmp.eq.f32.partialorder %v388_v55, %v390_v62  ;;  %v396_v6 = vcvt.f32.s32 %v390_v62 }
 0x906   :  { %v392_v2 = vsel %vm391_vm15, %v387_v0, inf }
 0x907   :  { %393 = vmin.xlane.f32.xlu0 %v392_v2  ;;  %v397_v7 = vshll.u32 %v396_v6, 16 }
 0x908   :  { %v405_v3 = vpop.xlane.xlu1 %404 }
 0x909   :  { %vm406_vm1 = vcmp.eq.f32.partialorder %v403_v59, %v405_v3  ;;  %v411_v9 = vcvt.f32.s32 %v405_v3 }
 0x90a   :  { %v407_v5 = vsel %vm406_vm1, %v402_v4, inf }
 0x90b   :  { %408 = vmin.xlane.f32.xlu1 %v407_v5  ;;  %v412_v13 = vshll.u32 %v411_v9, 16 }
 0x994   :  { %v394_v51 = vpop.xlane.xlu0 %393 }
 0x995   :  { %v395_v10 = vcvt.f32.s32 %v394_v51 }
 0x997   :  { %v398_v56 = vadd.s32 %v397_v7, %v395_v10 }
 0x998   :  { %v409_v12 = vpop.xlane.xlu1 %408 }
 0x999   :  { %v773_v14 = vsel %vm483_vm4, %v493_v40, %v398_v56  ;;  %v410_v15 = vcvt.f32.s32 %v409_v12  ;;  %vm414_vm5 = vcmp.eq.s32.totalorder %v686_v27, %v398_v56  ;;  %v593_v40 = vpop.eup %592 }
 0x99a   :  { %v416_v16 = vsel %vm414_vm5, -inf, %v372_v42  ;;  %v464_v42 = vsel %vm197_vm0, %v593_v40, 0.0  ;;  %v595_v43 = vpop.eup %594 }
 0x99b   :  { %v413_v17 = vadd.s32 %v412_v13, %v410_v15  ;;  %v418_v18 = vsel %vm197_vm0, %v416_v16, -inf  ;;  %v467_v44 = vsel %vm197_vm0, %v595_v43, 0.0 }
 0x99c   :  { %419 = vmax.xlane.f32.xlu0 %v418_v18 }
 0x99d   :  { %v778_v19 = vsel %vm483_vm4, %v494_v45, %v413_v17  ;;  %vm415_vm6 = vcmp.eq.s32.totalorder %v686_v27, %v413_v17  ;;  %v475_v45 = vsel %vm474_vm2, %v688_v28, %v712_v60  ;;  %v482_v60 = vsel %vm480_vm10, %v479_v53, %v751_v11 }
 0x99e   :  { %v417_v21 = vsel %vm415_vm6, -inf, %v373_v46 }
 0x99f   :  { %v421_v22 = vsel %vm197_vm0, %v417_v21, -inf }
 0x9a0   :  { %422 = vmax.xlane.f32.xlu1 %v421_v22 }
 0xa29   :  { %v420_v30 = vpop.xlane.xlu0 %419 }
 0xa2a   :  { %vm424_vm7 = vcmp.eq.f32.partialorder %v416_v16, %v420_v30 }
 0xa2b   :  { %v426_v32 = vsel %vm424_vm7, %v686_v27, 64 }
 0xa2c   :  { %v428_v34 = vsel %vm197_vm0, %v426_v32, 2147483647 }
 0xa2d   :  { %v423_v35 = vpop.xlane.xlu1 %422  ;;  %v430_v37 = vshra.s32 %v428_v34, 16  ;;  %v429_v54 = vand.u32 65535, %v428_v34 }
 0xa2e   :  { %vm425_vm8 = vcmp.eq.f32.partialorder %v417_v21, %v423_v35 }
 0xa2f   :  { %v427_v38 = vsel %vm425_vm8, %v686_v27, 64  ;;  %v432_v39 = vcvt.s32.f32 %v430_v37  ;;  %v478_v27 = vsel %vm477_vm3, %v475_v45, %v726_v33  ;;  %v485_v33 = vsel %vm483_vm4, %v482_v60, %v767_v52 }
 0xa30   :  { %v443_v20 = vsel %vm197_vm0, %v427_v38, 2147483647  ;;  %v481_v46 = vsel %vm480_vm10, %v478_v27, %v746_v8  ;;  %v431_v58 = vcvt.s32.f32 %v429_v54  ;;  %vm515_vm3 = vcmask 44032  }
 0xa31   :  { %433 = vmin.xlane.f32.xlu0 %v432_v39  ;;  %v445_v23 = vshra.s32 %v443_v20, 16  ;;  %v484_v47 = vsel %vm483_vm4, %v481_v46, %v762_v48  ;;  %v488_v48 = vsel %vm486_vm9, %v485_v33, %v423_v35  ;;  %v444_v59 = vand.u32 65535, %v443_v20 }
 0xa32   :  { %v487_v50 = vsel %vm486_vm9, %v484_v47, %v420_v30  ;;  %v500_v57 = vsub.f32 %v488_v48, %v694_v31  ;;  %vm518_vm10 = vcmask 48128  }
 0xa33   :  { %v447_v41 = vcvt.s32.f32 %v445_v23  ;;  %v499_v8 = vsub.f32 %v487_v50, %v688_v28  ;;  %v446_v0 = vcvt.s32.f32 %v444_v59 }
 0xa34   :  { %v503_v36 = vmul.f32 1.442695, %v500_v57 }
 0xa35   :  { %448 = vmin.xlane.f32.xlu1 %v447_v41  ;;  %465 = vadd.xlane.f32.xlu0 %v464_v42  ;;  %v501_v55 = vmul.f32 1.442695, %v499_v8 }
 0xa37   :  { %596 = vpow2.f32 %v501_v55 }
 0xa39   :  { %468 = vadd.xlane.f32.xlu1 %v467_v44 }
 0xa41   :  { %v597_v1 = vpop.eup %596 }
 0xabe   :  { %v434_v63 = vpop.xlane.xlu0 %433 }
 0xabf   :  { %vm435_vm0 = vcmp.eq.f32.partialorder %v432_v39, %v434_v63  ;;  %v440_v7 = vcvt.f32.s32 %v434_v63 }
 0xac0   :  { %v436_v61 = vsel %vm435_vm0, %v431_v58, inf }
 0xac1   :  { %437 = vmin.xlane.f32.xlu0 %v436_v61  ;;  %v441_v10 = vshll.u32 %v440_v7, 16 }
 0xac2   :  { %v449_v11 = vpop.xlane.xlu1 %448  ;;  %v466_v62 = vpop.xlane.xlu0 %465 }
 0xac3   :  { %598 = vrcp.f32 %v466_v62  ;;  %vm450_vm2 = vcmp.eq.f32.partialorder %v447_v41, %v449_v11  ;;  %v455_v56 = vcvt.f32.s32 %v449_v11 }
 0xac4   :  { %v451_v28 = vsel %vm450_vm2, %v446_v0, inf  ;;  %600 = vpow2.f32 %v503_v36 }
 0xac5   :  { %452 = vmin.xlane.f32.xlu1 %v451_v28  ;;  %v456_v16 = vshll.u32 %v455_v56, 16 }
 0xac6   :  { %v469_v52 = vpop.xlane.xlu1 %468 }
 0xac7   :  { %602 = vrcp.f32 %v469_v52 }
 0xacd   :  { %v599_v31 = vpop.eup %598 }
 0xace   :  { %v505_v2 = vmul.f32 %v599_v31, %v597_v1  ;;  %v601_v3 = vpop.eup %600 }
 0xad0   :  { %v549_v4 = vpack.c.bf16 %v505_v2, %v505_v2 }
 0xad1   :  { %v603_v5 = vpop.eup %602 }
 0xad2   :  { %516 = vst.msk [vmem:[%s832_s2] sm:$0xf] %vm515_vm3, %v549_v4  ;;  %v506_v6 = vmul.f32 %v603_v5, %v601_v3 }
 0xad4   :  { %v550_v51 = vpack.c.bf16 %v506_v6, %v506_v6 }
 0xad6   :  { %517 = vst.msk [vmem:[%s832_s2 + $0x4] sm:$0xf] %vm515_vm3, %v550_v51 }
 0xb4e   :  { %v438_v9 = vpop.xlane.xlu0 %437 }
 0xb4f   :  { %v439_v12 = vcvt.f32.s32 %v438_v9 }
 0xb51   :  { %v442_v13 = vadd.s32 %v441_v10, %v439_v12 }
 0xb52   :  { %v453_v15 = vpop.xlane.xlu1 %452 }
 0xb53   :  { %v497_v17 = vsel %vm486_vm9, %v773_v14, %v442_v13  ;;  %v454_v18 = vcvt.f32.s32 %v453_v15 }
 0xb54   :  { %519 = vst.msk [vmem:[%s833_s3] sm:$0xff] %vm518_vm10, %v497_v17 }
 0xb55   :  { %v457_v21 = vadd.s32 %v456_v16, %v454_v18 }
 0xb57   :  { %v498_v22 = vsel %vm486_vm9, %v778_v19, %v457_v21 }
 0xb58   :  { %520 = vst.msk [vmem:[%s833_s3 + $0x8] sm:$0xff] %vm518_vm10, %v498_v22 }

</bundles_post_ra>
